<compile_context>
chip_gen: v7x
topology: tpu7x:2x2x1
jax: 0.10.0
libtpu: 0.0.40
codegen_flags: <defaults>
</compile_context>

<pallas_src>
import functools

import jax
import jax.numpy as jnp
from jax.experimental import pallas as pl
from jax.experimental.pallas import tpu as pltpu


def clstm_cell_kernel(p_ref, w_ref, b_ref, cx_ref, hy_ref, cy_ref,
                      *, num_features):
    """One grid step = one TM-wide slab of the flattened (B*H*W) axis.

    p_ref  : (Kcp, TM)      im2col patches, transposed (contraction on sublanes)
    w_ref  : (4*F, Kcp)     conv weights as a matrix (resident across steps)
    b_ref  : (4*F, 1)       conv bias (f32)
    cx_ref : (F, TM)        previous cell state slab
    hy_ref : (F, TM)        new hidden state slab (output, lane-dense)
    cy_ref : (F, TM)        new cell state slab   (output, lane-dense)
    """
    F = num_features

    # Single MXU matmul: (4F, Kcp) @ (Kcp, TM) -> (4F, TM), f32 accumulation.
    gates = jnp.dot(w_ref[...], p_ref[...], preferred_element_type=jnp.float32)
    gates = gates + b_ref[...]                       # broadcast (4F,1) over lanes

    # Gate slices along the sublane axis (F is a multiple of 8 -> cheap).
    ingate     = jax.nn.sigmoid(gates[0 * F:1 * F, :])
    forgetgate = jax.nn.sigmoid(gates[1 * F:2 * F, :])
    cellgate   = jnp.tanh(      gates[2 * F:3 * F, :])
    outgate    = jax.nn.sigmoid(gates[3 * F:4 * F, :])

    cx = cx_ref[...].astype(jnp.float32)
    cy = forgetgate * cx + ingate * cellgate
    hy = outgate * jnp.tanh(cy)

    cy_ref[...] = cy.astype(cy_ref.dtype)
    hy_ref[...] = hy.astype(hy_ref.dtype)


def clstm_cell_forward(x_nchw, hx_nchw, cx_nchw, weight_oihw, bias,
                       *, filter_size, dilation=1, block_m=256,
                       matmul_dtype=jnp.float32):
    """Pallas ConvLSTM cell forward. Inputs/outputs use PyTorch NCHW layout."""
    B, Ci, H, W = x_nchw.shape
    F = hx_nchw.shape[1]
    K = filter_size
    assert ((K - 1) * dilation) % 2 == 0, (
        "Symmetric 'same' padding requires (filter_size-1)*dilation to be even.")
    pad = (K - 1) * dilation // 2
    Cin = Ci + F
    Kc = K * K * Cin
    Kcp = -(-Kc // 8) * 8                      # pad contraction dim to x8 sublanes
    M = B * H * W
    out_dtype = x_nchw.dtype

    # ---- XLA glue: channel concat (input first, then hx), channel-first, pad.
    combined = jnp.concatenate([x_nchw, hx_nchw], axis=1)          # (B, Cin, H, W)
    comb_cf = jnp.transpose(combined, (1, 0, 2, 3))                # (Cin, B, H, W)
    xp = jnp.pad(comb_cf, ((0, 0), (0, 0), (pad, pad), (pad, pad)))

    # ---- im2col directly in transposed layout: (K*K*Cin, B*H*W), tap-major
    # (kh, kw) outer / channel inner -- so the 9x duplicated tensor is never
    # transposed afterwards.
    taps = []
    for kh in range(K):
        for kw in range(K):
            oh, ow = kh * dilation, kw * dilation
            taps.append(xp[:, :, oh:oh + H, ow:ow + W])            # (Cin, B, H, W)
    patches_t = jnp.concatenate(taps, axis=0).reshape(Kc, M)       # (Kc, M)
    patches_t = patches_t.astype(matmul_dtype)

    # Weight OIHW (4F, Cin, K, K) -> (4F, K*K*Cin) matching tap-major (kh,kw,c)
    # layout; gate order along out-channels (i, f, g, o) is preserved.
    w_mat = jnp.transpose(weight_oihw, (0, 2, 3, 1)).reshape(4 * F, Kc)
    w_mat = w_mat.astype(matmul_dtype)
    b_col = bias.reshape(4 * F, 1).astype(jnp.float32)

    # Zero-pad the contraction dim to Kcp (zeros contribute nothing).
    if Kcp != Kc:
        patches_t = jnp.pad(patches_t, ((0, Kcp - Kc), (0, 0)))
        w_mat = jnp.pad(w_mat, ((0, 0), (0, Kcp - Kc)))

    # Cell state in (F, B*H*W) so kernel outputs are lane-dense.
    cx_t = jnp.transpose(cx_nchw, (1, 0, 2, 3)).reshape(F, M)

    # ---- Tile the flattened B*H*W axis (lane axis); pad to a multiple of TM.
    TM = min(block_m, ((M + 127) // 128) * 128)
    Mp = -(-M // TM) * TM
    if Mp != M:
        patches_t = jnp.pad(patches_t, ((0, 0), (0, Mp - M)))
        cx_t = jnp.pad(cx_t, ((0, 0), (0, Mp - M)))

    kernel = functools.partial(clstm_cell_kernel, num_features=F)

    hy_t, cy_t = pl.pallas_call(
        kernel,
        out_shape=(jax.ShapeDtypeStruct((F, Mp), out_dtype),
                   jax.ShapeDtypeStruct((F, Mp), out_dtype)),
        grid_spec=pltpu.PrefetchScalarGridSpec(
            num_scalar_prefetch=0,
            grid=(Mp // TM,),
            in_specs=[
                pl.BlockSpec((Kcp, TM), lambda i: (0, i)),      # patches slab
                pl.BlockSpec((4 * F, Kcp), lambda i: (0, 0)),   # weights (resident)
                pl.BlockSpec((4 * F, 1), lambda i: (0, 0)),     # bias (resident)
                pl.BlockSpec((F, TM), lambda i: (0, i)),        # cx slab
            ],
            out_specs=[
                pl.BlockSpec((F, TM), lambda i: (0, i)),        # hy slab (lane-dense)
                pl.BlockSpec((F, TM), lambda i: (0, i)),        # cy slab (lane-dense)
            ],
        ),
        compiler_params=pltpu.CompilerParams(
            dimension_semantics=("parallel",)),
    )(patches_t, w_mat, b_col, cx_t)

    # ---- Back to NCHW.
    hy = jnp.transpose(hy_t[:, :M].reshape(F, B, H, W), (1, 0, 2, 3))
    cy = jnp.transpose(cy_t[:, :M].reshape(F, B, H, W), (1, 0, 2, 3))
    return hy, cy


def clstm_cell_reference(x, hx, cx, weight, bias, *, filter_size, dilation=1):
    """Pure-JAX reference (NCHW), mirrors the PyTorch forward exactly."""
    pad = (filter_size - 1) * dilation // 2
    combined = jnp.concatenate([x, hx], axis=1)
    gates = jax.lax.conv_general_dilated(
        combined, weight, window_strides=(1, 1),
        padding=[(pad, pad), (pad, pad)],
        rhs_dilation=(dilation, dilation),
        dimension_numbers=("NCHW", "OIHW", "NCHW"),
    ) + bias.reshape(1, -1, 1, 1)
    F = hx.shape[1]
    i, f, g, o = jnp.split(gates, 4, axis=1)
    i = jax.nn.sigmoid(i)
    f = jax.nn.sigmoid(f)
    g = jnp.tanh(g)
    o = jax.nn.sigmoid(o)
    cy = f * cx + i * g
    hy = o * jnp.tanh(cy)
    return hy, cy


if __name__ == "__main__":
    # Small deterministic problem: B=2, C_in=4, num_features=32, H=W=16, K=3.
    # Flattened matmul M = B*H*W = 512 -> two 256-wide "parallel" grid steps.
    B, Ci, F, H, W, K = 2, 4, 32, 16, 16, 3
    dilation = 1
    Cin = Ci + F

    key = jax.random.PRNGKey(0)
    kx, kh, kc, kw, kb = jax.random.split(key, 5)

    x = jax.random.normal(kx, (B, Ci, H, W), dtype=jnp.float32)
    hx = jax.random.normal(kh, (B, F, H, W), dtype=jnp.float32)
    cx = jax.random.normal(kc, (B, F, H, W), dtype=jnp.float32)

    # Deterministic Conv2d-style init (kaiming-uniform-ish bounds).
    fan_in = Cin * K * K
    bound = 1.0 / (fan_in ** 0.5)
    weight = jax.random.uniform(kw, (4 * F, Cin, K, K),
                                minval=-bound, maxval=bound, dtype=jnp.float32)
    bias = jax.random.uniform(kb, (4 * F,),
                              minval=-bound, maxval=bound, dtype=jnp.float32)

    hy_ref, cy_ref = clstm_cell_reference(x, hx, cx, weight, bias,
                                          filter_size=K, dilation=dilation)

    # f32 matmul path: tight tolerance check.
    hy, cy = clstm_cell_forward(x, hx, cx, weight, bias,
                                filter_size=K, dilation=dilation,
                                matmul_dtype=jnp.float32)
    hy, cy = jax.block_until_ready((hy, cy))
    assert hy.shape == (B, F, H, W) and cy.shape == (B, F, H, W)
    assert jnp.allclose(hy, hy_ref, atol=1e-4, rtol=1e-4)
    assert jnp.allclose(cy, cy_ref, atol=1e-4, rtol=1e-4)

    # bf16 matmul-operand path (f32 accumulation): fast MXU/DMA variant.
    hy_b, cy_b = clstm_cell_forward(x, hx, cx, weight, bias,
                                    filter_size=K, dilation=dilation,
                                    matmul_dtype=jnp.bfloat16)
    hy_b, cy_b = jax.block_until_ready((hy_b, cy_b))
    assert jnp.allclose(hy_b, hy_ref, atol=2e-2, rtol=2e-2)
    assert jnp.allclose(cy_b, cy_ref, atol=2e-2, rtol=2e-2)

    print("KERNEL_OK")
</pallas_src>

<mosaic_0001>
module attributes {stable_mosaic.version = 11 : i64} {
  func.func @clstm_cell_kernel(%arg0: i32, %arg1: memref<328x256xf32, #tpu.memory_space<vmem>>, %arg2: memref<128x328xf32, #tpu.memory_space<vmem>>, %arg3: memref<128x1xf32, #tpu.memory_space<vmem>>, %arg4: memref<32x256xf32, #tpu.memory_space<vmem>>, %arg5: memref<32x256xf32, #tpu.memory_space<vmem>>, %arg6: memref<32x256xf32, #tpu.memory_space<vmem>>) attributes {dimension_semantics = [#tpu.dimension_semantics<parallel>], iteration_bounds = array<i64: 2>, scalar_prefetch = 0 : i64, scratch_operands = 0 : i64, tpu.core_type = #tpu.core_type<tc>, window_params = [{transform_indices = @transform_0, window_bounds = array<i64: 328, 256>}, {pipeline_mode = #tpu.pipeline_mode<synchronous>, transform_indices = @transform_1, window_bounds = array<i64: 128, 328>}, {pipeline_mode = #tpu.pipeline_mode<synchronous>, transform_indices = @transform_2, window_bounds = array<i64: 128, 1>}, {transform_indices = @transform_3, window_bounds = array<i64: 32, 256>}, {transform_indices = @transform_4, window_bounds = array<i64: 32, 256>}, {transform_indices = @transform_5, window_bounds = array<i64: 32, 256>}]} {
    %c0 = arith.constant 0 : index
    %c0_0 = arith.constant 0 : index
    %0 = vector.load %arg2[%c0, %c0_0] : memref<128x328xf32, #tpu.memory_space<vmem>>, vector<128x328xf32>
    %c0_1 = arith.constant 0 : index
    %c0_2 = arith.constant 0 : index
    %1 = vector.load %arg1[%c0_1, %c0_2] : memref<328x256xf32, #tpu.memory_space<vmem>>, vector<328x256xf32>
    %cst = arith.constant dense<0.000000e+00> : vector<128x256xf32>
    %2 = tpu.matmul %0, %1, %cst {dimension_numbers = #tpu.dot_dimension_numbers<[1], [0], [0], [1], [0, 0, 1, 1], [], []>} : vector<128x328xf32>, vector<328x256xf32>, vector<128x256xf32> -> vector<128x256xf32>
    %c0_3 = arith.constant 0 : index
    %c0_4 = arith.constant 0 : index
    %3 = vector.load %arg3[%c0_3, %c0_4] : memref<128x1xf32, #tpu.memory_space<vmem>>, vector<128x1xf32>
    %4 = vector.broadcast %3 : vector<128x1xf32> to vector<128x256xf32>
    %5 = arith.addf %2, %4 : vector<128x256xf32>
    %6 = vector.extract_strided_slice %5 {offsets = [0, 0], sizes = [32, 256], strides = [1, 1]} : vector<128x256xf32> to vector<32x256xf32>
    %7 = arith.negf %6 : vector<32x256xf32>
    %8 = math.exp %7 : vector<32x256xf32>
    %cst_5 = arith.constant 1.000000e+00 : f32
    %9 = vector.broadcast %cst_5 : f32 to vector<32x256xf32>
    %10 = arith.addf %9, %8 : vector<32x256xf32>
    %11 = arith.divf %9, %10 : vector<32x256xf32>
    %12 = vector.extract_strided_slice %5 {offsets = [32, 0], sizes = [32, 256], strides = [1, 1]} : vector<128x256xf32> to vector<32x256xf32>
    %13 = arith.negf %12 : vector<32x256xf32>
    %14 = math.exp %13 : vector<32x256xf32>
    %cst_6 = arith.constant 1.000000e+00 : f32
    %15 = vector.broadcast %cst_6 : f32 to vector<32x256xf32>
    %16 = arith.addf %15, %14 : vector<32x256xf32>
    %17 = arith.divf %15, %16 : vector<32x256xf32>
    %18 = vector.extract_strided_slice %5 {offsets = [64, 0], sizes = [32, 256], strides = [1, 1]} : vector<128x256xf32> to vector<32x256xf32>
    %19 = math.tanh %18 : vector<32x256xf32>
    %20 = vector.extract_strided_slice %5 {offsets = [96, 0], sizes = [32, 256], strides = [1, 1]} : vector<128x256xf32> to vector<32x256xf32>
    %21 = arith.negf %20 : vector<32x256xf32>
    %22 = math.exp %21 : vector<32x256xf32>
    %cst_7 = arith.constant 1.000000e+00 : f32
    %23 = vector.broadcast %cst_7 : f32 to vector<32x256xf32>
    %24 = arith.addf %23, %22 : vector<32x256xf32>
    %25 = arith.divf %23, %24 : vector<32x256xf32>
    %c0_8 = arith.constant 0 : index
    %c0_9 = arith.constant 0 : index
    %26 = vector.load %arg4[%c0_8, %c0_9] : memref<32x256xf32, #tpu.memory_space<vmem>>, vector<32x256xf32>
    %27 = arith.mulf %17, %26 : vector<32x256xf32>
    %28 = arith.mulf %11, %19 : vector<32x256xf32>
    %29 = arith.addf %27, %28 : vector<32x256xf32>
    %30 = math.tanh %29 : vector<32x256xf32>
    %31 = arith.mulf %25, %30 : vector<32x256xf32>
    %c0_10 = arith.constant 0 : index
    %c0_11 = arith.constant 0 : index
    %32 = vector.load %arg6[%c0_10, %c0_11] : memref<32x256xf32, #tpu.memory_space<vmem>>, vector<32x256xf32>
    tpu.vector_store %arg6[%c0_10, %c0_11], %29 {strides = array<i32>} : memref<32x256xf32, #tpu.memory_space<vmem>>, vector<32x256xf32>,
    %c0_12 = arith.constant 0 : index
    %c0_13 = arith.constant 0 : index
    %33 = vector.load %arg5[%c0_12, %c0_13] : memref<32x256xf32, #tpu.memory_space<vmem>>, vector<32x256xf32>
    tpu.vector_store %arg5[%c0_12, %c0_13], %31 {strides = array<i32>} : memref<32x256xf32, #tpu.memory_space<vmem>>, vector<32x256xf32>,
    return
  }
  func.func @transform_0(%arg0: i32) -> (i32, i32) {
    %c0_i32 = arith.constant 0 : i32
    %c0_i32_0 = arith.constant 0 : i32
    return %c0_i32, %arg0 : i32, i32
  }
  func.func @transform_1(%arg0: i32) -> (i32, i32) {
    %c0_i32 = arith.constant 0 : i32
    %c0_i32_0 = arith.constant 0 : i32
    %c0_i32_1 = arith.constant 0 : i32
    return %c0_i32, %c0_i32_0 : i32, i32
  }
  func.func @transform_2(%arg0: i32) -> (i32, i32) {
    %c0_i32 = arith.constant 0 : i32
    %c0_i32_0 = arith.constant 0 : i32
    %c0_i32_1 = arith.constant 0 : i32
    return %c0_i32, %c0_i32_0 : i32, i32
  }
  func.func @transform_3(%arg0: i32) -> (i32, i32) {
    %c0_i32 = arith.constant 0 : i32
    %c0_i32_0 = arith.constant 0 : i32
    return %c0_i32, %arg0 : i32, i32
  }
  func.func @transform_4(%arg0: i32) -> (i32, i32) {
    %c0_i32 = arith.constant 0 : i32
    %c0_i32_0 = arith.constant 0 : i32
    return %c0_i32, %arg0 : i32, i32
  }
  func.func @transform_5(%arg0: i32) -> (i32, i32) {
    %c0_i32 = arith.constant 0 : i32
    %c0_i32_0 = arith.constant 0 : i32
    return %c0_i32, %arg0 : i32, i32
  }
}

</mosaic_0001>

<bundles_post_ra>
// kernel: tpu_custom_call.1
= control target key start
LH: loop header
LB: loop body
LE: loop exit
PB: predicated region body
PF: predicated region fallthrough
CT: control target
= control target key end

     0   :  { %11 = vsyncpa [#allocation3], 0  ;;  %s2508_s0 = inlined_call_operand.hbm [shape: f32[328,512], index: 0, kind: input, shape index: {}]   ;;  %s2509_s1 = inlined_call_operand.vmem [shape: f32[128,328], index: 1, kind: input, shape index: {}]   ;;  %s2510_s2 = inlined_call_operand.vmem [shape: f32[128,1], index: 2, kind: input, shape index: {}]   ;;  %s2511_s3 = inlined_call_operand.vmem [shape: f32[32,512], index: 3, kind: input, shape index: {}]   ;;  %s2512_s4 = inlined_call_operand.hbm [shape: f32[32,512], index: 4, kind: output, shape index: {0}]   ;;  %s2513_s5 = inlined_call_operand.hbm [shape: f32[32,512], index: 5, kind: output, shape index: {1}]  }
   0x1   :  { %13 = vsyncpa [#allocation3 + $0x1], 0 }
   0x2   :  { %14 = vsyncpa [#allocation4], 0 }
   0x3   :  { %16 = vsyncpa [#allocation4 + $0x1], 0 }
   0x4   :  { %17 = vsyncpa [#allocation8], 0 }
   0x5   :  { %19 = vsyncpa [#allocation8 + $0x1], 0  ;;  %s1846_s18 = smov 0   ;;  %s1848_s19 = smov 0  }
   0x6   :  { %s1850_s20 = smov 0   ;;  %s1852_s21 = smov 0  }
   0x7 LB: > { %s1867_s22 = sadd.s32 4294967295, %s1803_s21   ;;  %s1283_s23 = sadd.s32 4294967294, %s1803_s21   ;;  %s1803_s21 = sphi %s1852_s21, %s2526_s21   ;;  %s1799_s20 = sphi %s1850_s20, %s2525_s20   ;;  %s1795_s19 = sphi %s1848_s19, %s2524_s19   ;;  %s1791_s18 = sphi %s1846_s18, %s2523_s18  }
   0x8   : > { %s1871_s24 = sadd.s32 1, %s1803_s21   ;;  %s32_s25 = sadd.s32 1, %s1799_s20 }
   0x9   : > { %s29_s26 = ssub.s32 %s1803_s21, %s1871_s24  ;;  %p39_p0 = scmp.ne.s32.totalorder %s1799_s20, %s1795_s19 }
   0xa   : > { %p30_p1 = scmp.eq.s32.totalorder %s29_s26, 0  ;;  %p40_p2 = scmp.eq.s32.totalorder %s1803_s21, 0 }
   0xb   : > { %p45_p3 = scmp.ne.s32.totalorder %s1795_s19, %s1791_s18  ;;  %p46_p4 = scmp.eq.s32.totalorder %s1867_s22, 0 }
   0xc   : > { %s1883_s27 = scalar_select %p30_p1, %s1799_s20, %s32_s25  }
   0xd   : > { %p1885_p5 = por %p40_p2, %p39_p0  ;;  %p1889_p6 = por %p46_p4, %p45_p3 }
   0xe   : > { %p137_p7 = scmp.eq.s32.totalorder %s1867_s22, 1  ;;  %p143_p8 = scmp.eq.s32.totalorder %s1283_s23, 1 }
   0xf   : > { %p2514_p11 = scmp.ge.s32.totalorder %s1803_s21, 2 }
  0x10   : > { %p1894_p9 = por %p137_p7, %p39_p0  ;;  %p1898_p10 = por %p143_p8, %p45_p3 }
  0x11   : > { %191 = sbr.rel (%p2514_p11) target bundleno = 54 (0x36), region = 24  ;;  %s1906_s7 = sand.u32 (!%p2514_p11), 1, %s1799_s20  }
  0x12   : > { %s2518_s30 = scalar_select %p1894_p9, 1, 0 }
  0x13   : > { %s2519_s6 = scalar_select %p1898_p10, 1, 0 }
  0x14   : > { %s1343_s8 = sshll.u32 (!%p2514_p11), %s1803_s21, 8  ;;  %s1491_s9 = smul.u32 (!%p2514_p11), 656, %s1906_s7 }
  0x15   : > { %s1913_s12 = scalar_lea.hbm (!%p2514_p11), %s2508_s0, %s1343_s8  ;;  %s196_s15 = scalar_lea.sflag (!%p2514_p11), [#allocation3], %s1906_s7 }
  0x16   : > { %s199_s13 = scalar_lea.vmem (!%p2514_p11), [#allocation2], %s1491_s9  ;;  %s1677_s16 = scalar_lea.hbm (!%p2514_p11), %s1913_s12, 10496 }
  0x17   : > { %s206_s14 = sshll.u32 (!%p2514_p11), %s199_s13, 4  ;;  %p1678_p12 = scmp.ne.s32.totalorder (!%p2514_p11), %s1913_s12, %s1677_s16  ;;  %s1915_s14 = int_to_ptr.vmem [resolvable:$true] %s206_s14 }
  0x18   : > { %s1681_s25 = scalar_lea.hbm %s2508_s0, 20992  ;;  %p1682_p1 = scmp.lt.u32.totalorder %s1913_s12, %s2508_s0 }
  0x19   : > { %p1679_p13 = pnand %p1678_p12, %p1885_p5  ;;  %p1683_p2 = scmp.lt.u32.totalorder %s1681_s25, %s1677_s16 }
  0x1a   : > { %p1685_p4 = scmp.lt.u32.totalorder %s1677_s16, %s1913_s12 }
  0x1b   : > { %p1680_p0 = pneg %p1679_p13  ;;  %p1684_p3 = por %p1683_p2, %p1682_p1 }
  0x1d   : > { %p1686_p7 = por %p1685_p4, %p1684_p3 }
  0x1f   : > { %p1687_p8 = pnand %p1686_p7, %p1680_p0 }
  0x21   : > { %1690 = shalt.err (!%p1687_p8)
}
  0x22   : > { %s1691_s9 = scalar_lea.vmem %s1915_s14, 10496  ;;  %s1805_s10 = smov [#allocation2]  }
  0x23   : > { %p1692_p12 = scmp.ne.s32.totalorder %s1915_s14, %s1691_s9  ;;  %s1695_s11 = sshll.u32 %s1805_s10, 4  ;;  %s1696_s11 = int_to_ptr.vmem [resolvable:$false] %s1695_s11 }
  0x24   : > { %s1697_s13 = scalar_lea.vmem %s1696_s11, 20992  ;;  %p1698_p10 = scmp.lt.s32.totalorder %s1915_s14, %s1696_s11 }
  0x25   : > { %p1693_p13 = pnand %p1692_p12, %p1885_p5  ;;  %p1699_p9 = scmp.lt.s32.totalorder %s1697_s13, %s1691_s9 }
  0x27   : > { %p1694_p11 = pneg %p1693_p13  ;;  %p1700_p1 = por %p1699_p9, %p1698_p10 }
  0x29   : > { %p1701_p2 = pnand %p1700_p1, %p1694_p11 }
  0x2b   : > { %1704 = shalt.err (!%p1701_p2)
}
  0x2c   : > { %s1806_s16 = smov 512   ;;  %s1807_s17 = smov 256  }
  0x2d   : > { %s1808_s23 = smov 16   ;;  %215 = sbr.rel (!%p1885_p5) target bundleno = 54 (0x36), region = 32 }
  0x2e   : > { %1493 = dma.hbm_to_vmem [thread:$0]  (%p1885_p5), %s1913_s12, 10496, %s1915_s14, %s196_s15, %s1806_s16, %s1807_s17, %s1808_s23  }
  0x2f   : > { %s1288_s25 = sshll.u32 (%p1885_p5), %s1906_s7, 6  ;;  %s1344_s26 = sshll.u32 (%p1885_p5), %s1803_s21, 4 }
  0x30   : > { %s222_s10 = scalar_lea.vmem (%p1885_p5), %s2511_s3, %s1344_s26  ;;  %s219_s11 = scalar_lea.vmem (%p1885_p5), [#allocation5], %s1288_s25 }
  0x31   : > { %v235_v0 = vld [vmem:[%s222_s10] sm:$0xff] (%p1885_p5)  ;;  %v237_v1 = vld [vmem:[%s222_s10 + $0x8] sm:$0xff] (%p1885_p5) }
  0x32   : > { %v239_v2 = vld [vmem:[%s222_s10 + $0x20] sm:$0xff] (%p1885_p5)  ;;  %236 = vst [vmem:[%s219_s11] sm:$0xff] (%p1885_p5), %v235_v0  ;;  %238 = vst [vmem:[%s219_s11 + $0x8] sm:$0xff] (%p1885_p5), %v237_v1  ;;  %v241_v3 = vld [vmem:[%s222_s10 + $0x28] sm:$0xff] (%p1885_p5) }
  0x33   : > { %240 = vst [vmem:[%s219_s11 + $0x10] sm:$0xff] (%p1885_p5), %v239_v2  ;;  %v243_v4 = vld [vmem:[%s222_s10 + $0x40] sm:$0xff] (%p1885_p5)  ;;  %v245_v5 = vld [vmem:[%s222_s10 + $0x48] sm:$0xff] (%p1885_p5)  ;;  %242 = vst [vmem:[%s219_s11 + $0x18] sm:$0xff] (%p1885_p5), %v241_v3 }
  0x34   : > { %244 = vst [vmem:[%s219_s11 + $0x20] sm:$0xff] %v243_v4  ;;  %246 = vst [vmem:[%s219_s11 + $0x28] sm:$0xff] %v245_v5  ;;  %v247_v6 = vld [vmem:[%s222_s10 + $0x60] sm:$0xff]  ;;  %v249_v7 = vld [vmem:[%s222_s10 + $0x68] sm:$0xff] }
  0x35   : > { %248 = vst [vmem:[%s219_s11 + $0x30] sm:$0xff] %v247_v6  ;;  %250 = vst [vmem:[%s219_s11 + $0x38] sm:$0xff] %v249_v7 }
  0x36 PF: > { %p1291_p5 = scmp.ge.s32.totalorder %s1803_s21, 1  ;;  %p255_p9 = scmp.lt.s32.totalorder %s1803_s21, 3 }
  0x38   : > { %p256_p10 = pnand %p1291_p5, %p255_p9 }
  0x39   : > { %s1951_s28 = sand.u32 (!%p256_p10), 1, %s1795_s19  }
  0x3a   : > { %259 = sbr.rel (%p256_p10) target bundleno = 469 (0x1d5), region = 55  ;;  %s262_s12 = scalar_lea.sflag (!%p256_p10), [#allocation3], %s1951_s28 }
  0x3b   : > { %s1492_s7 = smul.u32 (!%p256_p10), 656, %s1951_s28 }
  0x3d   : > { %s1955_s14 = scalar_lea.vmem (!%p256_p10), [#allocation2], %s1492_s7 }
  0x41   : > { %1778 = dma.done.wait (%p1889_p6), %s262_s12, 10496  }
  0x42   : > { %1780 = vsyncadd (%p1889_p6), %s262_s12, 4294956800  ;;  %v1809_v8 = vmov 0.0   ;;  %v361_v9 = vld [vmem:[%s1955_s14 + $0x8] sm:$0xff]  ;;  %v363_v10 = vld [vmem:[%s1955_s14 + $0x18] sm:$0xff]  ;;  %v1810_v12 = vmov 0   ;;  %vm538_vm0 = vcmask 588800  }
  0x43   : > { %812 = vmatprep.mubr.f32.mxu0 %v1809_v8  ;;  %v360_v11 = vld [vmem:[%s1955_s14] sm:$0xff]  ;;  %1547 = vset.pattern.permute.xlu0 %v1810_v12  ;;  %v1347_v13 = vpack.c.bf16 %v363_v10, %v361_v9  ;;  %v362_v14 = vld [vmem:[%s1955_s14 + $0x10] sm:$0xff]  ;;  %v365_v15 = vld [vmem:[%s1955_s14 + $0x28] sm:$0xff]  ;;  %s2338_s9 = sshll.u32 %s1951_s28, 6  ;;  %s1345_s7 = sshll.u32 %s1867_s22, 8 }
  0x44   : > { %1548 = vset.pattern.permute.xlu1 %v1810_v12  ;;  %v367_v16 = vld [vmem:[%s1955_s14 + $0x38] sm:$0xff]  ;;  %v1349_v17 = vpack.c.bf16 %v362_v14, %v360_v11  ;;  %v364_v19 = vld [vmem:[%s1955_s14 + $0x20] sm:$0xff]  ;;  %v366_v20 = vld [vmem:[%s1955_s14 + $0x30] sm:$0xff]  ;;  %s2349_s10 = scalar_lea.vmem [#allocation5], %s2338_s9  ;;  %s2365_s11 = scalar_lea.vmem [#allocation7], %s2338_s9 }
  0x45   : > { %v1351_v18 = vpack.c.bf16 %v367_v16, %v365_v15  ;;  %v369_v21 = vld [vmem:[%s1955_s14 + $0x48] sm:$0xff]  ;;  %1348 = vmatprep.subr.bf16.mxu1 %v1347_v13  ;;  %v371_v22 = vld [vmem:[%s1955_s14 + $0x58] sm:$0xff]  ;;  %v1353_v23 = vpack.c.bf16 %v366_v20, %v364_v19  ;;  %v368_v25 = vld [vmem:[%s1955_s14 + $0x40] sm:$0xff]  ;;  %s1160_s12 = sshll.u32 %s2365_s11, 4  ;;  %s2403_s13 = scalar_lea.hbm %s2513_s5, %s1345_s7  ;;  %s2405_s12 = int_to_ptr.vmem [resolvable:$true] %s1160_s12 }
  0x46   : > { %1350 = vmatpush1.bf16.msra.mxu1 %v1349_v17  ;;  %v1355_v24 = vpack.c.bf16 %v371_v22, %v369_v21  ;;  %v370_v26 = vld [vmem:[%s1955_s14 + $0x50] sm:$0xff]  ;;  %v373_v27 = vld [vmem:[%s1955_s14 + $0x68] sm:$0xff]  ;;  %v375_v28 = vld [vmem:[%s1955_s14 + $0x78] sm:$0xff]  ;;  %s1131_s16 = scalar_lea.sflag [#allocation8], %s1951_s28  ;;  %s1705_s17 = scalar_lea.vmem %s2405_s12, 1024 }
  0x47   : > { %1352 = vmatprep.subr.bf16.mxu1 %v1351_v18  ;;  %v1357_v29 = vpack.c.bf16 %v370_v26, %v368_v25  ;;  %v1359_v30 = vpack.c.bf16 %v375_v28, %v373_v27  ;;  %v372_v31 = vld [vmem:[%s1955_s14 + $0x60] sm:$0xff]  ;;  %v374_v32 = vld [vmem:[%s1955_s14 + $0x70] sm:$0xff]  ;;  %v377_v33 = vld [vmem:[%s1955_s14 + $0x88] sm:$0xff]  ;;  %p1706_p6 = scmp.ne.s32.totalorder %s2405_s12, %s1705_s17  ;;  %p2520_p11 = scmp.ne.s32.totalorder %s2518_s30, 0 }
  0x48   : > { %v379_v34 = vld [vmem:[%s1955_s14 + $0x98] sm:$0xff]  ;;  %v1361_v35 = vpack.c.bf16 %v374_v32, %v372_v31  ;;  %v376_v37 = vld [vmem:[%s1955_s14 + $0x80] sm:$0xff]  ;;  %v378_v38 = vld [vmem:[%s1955_s14 + $0x90] sm:$0xff]  ;;  %s1811_s23 = smov [#allocation7]  }
  0x49   : > { %v1363_v36 = vpack.c.bf16 %v379_v34, %v377_v33  ;;  %v381_v39 = vld [vmem:[%s1955_s14 + $0xa8] sm:$0xff]  ;;  %v383_v40 = vld [vmem:[%s1955_s14 + $0xb8] sm:$0xff]  ;;  %v1365_v41 = vpack.c.bf16 %v378_v38, %v376_v37  ;;  %v380_v42 = vld [vmem:[%s1955_s14 + $0xa0] sm:$0xff]  ;;  %p1707_p0 = pnand %p1706_p6, %p2520_p11  ;;  %s1709_s25 = sshll.u32 %s1811_s23, 4  ;;  %s1710_s25 = int_to_ptr.vmem [resolvable:$false] %s1709_s25 }
  0x4a   : > { %1354 = vmatpush1.bf16.msra.mxu1 %v1353_v23  ;;  %v425_v43 = vld [vmem:[%s1955_s14 + $0x208] sm:$0xff]  ;;  %v427_v44 = vld [vmem:[%s1955_s14 + $0x218] sm:$0xff]  ;;  %v1367_v45 = vpack.c.bf16 %v383_v40, %v381_v39  ;;  %v382_v46 = vld [vmem:[%s1955_s14 + $0xb0] sm:$0xff]  ;;  %s1711_s26 = scalar_lea.vmem %s1710_s25, 2048  ;;  %p1712_p4 = scmp.lt.s32.totalorder %s2405_s12, %s1710_s25 }
  0x4b   : > { %1356 = vmatprep.subr.bf16.mxu1 %v1355_v24  ;;  %v1411_v47 = vpack.c.bf16 %v427_v44, %v425_v43  ;;  %v424_v48 = vld [vmem:[%s1955_s14 + $0x200] sm:$0xff]  ;;  %v426_v49 = vld [vmem:[%s1955_s14 + $0x210] sm:$0xff]  ;;  %v385_v50 = vld [vmem:[%s1955_s14 + $0xc8] sm:$0xff]  ;;  %v1369_v55 = vpack.c.bf16 %v382_v46, %v380_v42  ;;  %p1708_p3 = pneg %p1707_p0  ;;  %p1713_p7 = scmp.lt.s32.totalorder %s1711_s26, %s1705_s17 }
  0x4c   : > { %v387_v51 = vld [vmem:[%s1955_s14 + $0xd8] sm:$0xff]  ;;  %v1413_v52 = vpack.c.bf16 %v426_v49, %v424_v48  ;;  %v429_v53 = vld [vmem:[%s1955_s14 + $0x228] sm:$0xff]  ;;  %v384_v56 = vld [vmem:[%s1955_s14 + $0xc0] sm:$0xff] }
  0x4d   : > { %1412 = vmatprep.subr.bf16.mxu0 %v1411_v47  ;;  %v431_v54 = vld [vmem:[%s1955_s14 + $0x238] sm:$0xff]  ;;  %v428_v58 = vld [vmem:[%s1955_s14 + $0x220] sm:$0xff]  ;;  %v430_v59 = vld [vmem:[%s1955_s14 + $0x230] sm:$0xff]  ;;  %v1371_v60 = vpack.c.bf16 %v387_v51, %v385_v50  ;;  %p1714_p8 = por %p1713_p7, %p1712_p4 }
  0x4e   : > { %1358 = vmatpush1.bf16.msra.mxu1 %v1357_v29  ;;  %1414 = vmatpush1.bf16.msra.mxu0 %v1413_v52  ;;  %v1415_v57 = vpack.c.bf16 %v431_v54, %v429_v53  ;;  %v386_v61 = vld [vmem:[%s1955_s14 + $0xd0] sm:$0xff]  ;;  %v1417_v62 = vpack.c.bf16 %v430_v59, %v428_v58  ;;  %v433_v63 = vld [vmem:[%s1955_s14 + $0x248] sm:$0xff]  ;;  %v435_v0 = vld [vmem:[%s1955_s14 + $0x258] sm:$0xff] }
  0x4f   : > { %1360 = vmatprep.subr.bf16.mxu1 %v1359_v30  ;;  %v389_v1 = vld [vmem:[%s1955_s14 + $0xe8] sm:$0xff]  ;;  %v391_v2 = vld [vmem:[%s1955_s14 + $0xf8] sm:$0xff]  ;;  %v1419_v3 = vpack.c.bf16 %v435_v0, %v433_v63  ;;  %v432_v4 = vld [vmem:[%s1955_s14 + $0x240] sm:$0xff]  ;;  %v1373_v6 = vpack.c.bf16 %v386_v61, %v384_v56  ;;  %p1715_p12 = pnand %p1714_p8, %p1708_p3 }
  0x50   : > { %1416 = vmatprep.subr.bf16.mxu0 %v1415_v57  ;;  %v434_v5 = vld [vmem:[%s1955_s14 + $0x250] sm:$0xff]  ;;  %v388_v7 = vld [vmem:[%s1955_s14 + $0xe0] sm:$0xff]  ;;  %v437_v10 = vld [vmem:[%s1955_s14 + $0x268] sm:$0xff]  ;;  %v1375_v12 = vpack.c.bf16 %v391_v2, %v389_v1 }
  0x51   : > { %v1421_v9 = vpack.c.bf16 %v434_v5, %v432_v4  ;;  %v439_v11 = vld [vmem:[%s1955_s14 + $0x278] sm:$0xff]  ;;  %v390_v13 = vld [vmem:[%s1955_s14 + $0xf0] sm:$0xff]  ;;  %v436_v15 = vld [vmem:[%s1955_s14 + $0x260] sm:$0xff] }
  0x52   : > { %1362 = vmatpush1.bf16.msra.mxu1 %v1361_v35  ;;  %1418 = vmatpush1.bf16.msra.mxu0 %v1417_v62  ;;  %v1423_v14 = vpack.c.bf16 %v439_v11, %v437_v10  ;;  %v438_v16 = vld [vmem:[%s1955_s14 + $0x270] sm:$0xff]  ;;  %v393_v17 = vld [vmem:[%s1955_s14 + $0x108] sm:$0xff]  ;;  %v395_v18 = vld [vmem:[%s1955_s14 + $0x118] sm:$0xff]  ;;  %v1377_v20 = vpack.c.bf16 %v390_v13, %v388_v7 }
  0x53   : > { %1364 = vmatprep.subr.bf16.mxu1 %v1363_v36  ;;  %1420 = vmatprep.subr.bf16.mxu0 %v1419_v3  ;;  %v313_v19 = vld [vmem:[%s2509_s1 + $0x8] sm:$0xff]  ;;  %v1425_v21 = vpack.c.bf16 %v438_v16, %v436_v15  ;;  %v1379_v22 = vpack.c.bf16 %v395_v18, %v393_v17  ;;  %v392_v23 = vld [vmem:[%s1955_s14 + $0x100] sm:$0xff]  ;;  %v394_v24 = vld [vmem:[%s1955_s14 + $0x110] sm:$0xff] }
  0x54   : > { %651 = vmatprep.mubr.f32.mxu1 %v313_v19  ;;  %v397_v25 = vld [vmem:[%s1955_s14 + $0x128] sm:$0xff]  ;;  %v399_v26 = vld [vmem:[%s1955_s14 + $0x138] sm:$0xff]  ;;  %v1381_v28 = vpack.c.bf16 %v394_v24, %v392_v23  ;;  %v396_v30 = vld [vmem:[%s1955_s14 + $0x120] sm:$0xff] }
  0x55   : > { %v441_v27 = vld [vmem:[%s1955_s14 + $0x288] sm:$0xff]  ;;  %v1383_v29 = vpack.c.bf16 %v399_v26, %v397_v25  ;;  %v398_v31 = vld [vmem:[%s1955_s14 + $0x130] sm:$0xff]  ;;  %v440_v32 = vld [vmem:[%s1955_s14 + $0x280] sm:$0xff] }
  0x56   : > { %1366 = vmatpush1.bf16.msra.mxu1 %v1365_v41  ;;  %1422 = vmatpush1.bf16.msra.mxu0 %v1421_v9  ;;  %v401_v33 = vld [vmem:[%s1955_s14 + $0x148] sm:$0xff]  ;;  %v403_v34 = vld [vmem:[%s1955_s14 + $0x158] sm:$0xff]  ;;  %v314_v35 = vld [vmem:[%s2509_s1 + $0x10] sm:$0xff]  ;;  %v1385_v36 = vpack.c.bf16 %v398_v31, %v396_v30 }
  0x57   : > { %1368 = vmatprep.subr.bf16.mxu1 %v1367_v45  ;;  %1424 = vmatprep.subr.bf16.mxu0 %v1423_v14  ;;  %v1387_v37 = vpack.c.bf16 %v403_v34, %v401_v33  ;;  %v400_v38 = vld [vmem:[%s1955_s14 + $0x140] sm:$0xff]  ;;  %v402_v39 = vld [vmem:[%s1955_s14 + $0x150] sm:$0xff]  ;;  %v405_v40 = vld [vmem:[%s1955_s14 + $0x168] sm:$0xff] }
  0x58   : > { %v407_v41 = vld [vmem:[%s1955_s14 + $0x178] sm:$0xff]  ;;  %v1389_v43 = vpack.c.bf16 %v402_v39, %v400_v38  ;;  %v404_v45 = vld [vmem:[%s1955_s14 + $0x160] sm:$0xff]  ;;  %v406_v46 = vld [vmem:[%s1955_s14 + $0x170] sm:$0xff] }
  0x59   : > { %v317_v42 = vld [vmem:[%s2509_s1 + $0x28] sm:$0xff]  ;;  %v1391_v44 = vpack.c.bf16 %v407_v41, %v405_v40  ;;  %v320_v49 = vld [vmem:[%s2509_s1 + $0x40] sm:$0xff]  ;;  %v1393_v51 = vpack.c.bf16 %v406_v46, %v404_v45  ;;  %v444_v52 = vld [vmem:[%s2510_s2 + $0x10] sm:$0xff] }
  0x5a   : > { %1370 = vmatpush1.bf16.msra.mxu1 %v1369_v55  ;;  %1426 = vmatpush1.bf16.msra.mxu0 %v1425_v21  ;;  %v409_v47 = vld [vmem:[%s1955_s14 + $0x188] sm:$0xff]  ;;  %v411_v48 = vld [vmem:[%s1955_s14 + $0x198] sm:$0xff]  ;;  %v442_v50 = vld [vmem:[%s2510_s2] sm:$0xff] }
  0x5b   : > { %1372 = vmatprep.subr.bf16.mxu1 %v1371_v60  ;;  %764 = vmatprep.subr.mxu0 %v441_v27  ;;  %v1395_v53 = vpack.c.bf16 %v411_v48, %v409_v47  ;;  %v408_v54 = vld [vmem:[%s1955_s14 + $0x180] sm:$0xff]  ;;  %v410_v55 = vld [vmem:[%s1955_s14 + $0x190] sm:$0xff]  ;;  %v443_v56 = vld [vmem:[%s2510_s2 + $0x8] sm:$0xff] }
  0x5c   : > { %460 = vperm.xlu0 %1547, %v442_v50   ;;  %v413_v57 = vld [vmem:[%s1955_s14 + $0x1a8] sm:$0xff]  ;;  %v415_v58 = vld [vmem:[%s1955_s14 + $0x1b8] sm:$0xff]  ;;  %470 = vperm.xlu1 %1548, %v444_v52   ;;  %v1397_v61 = vpack.c.bf16 %v410_v55, %v408_v54  ;;  %v412_v63 = vld [vmem:[%s1955_s14 + $0x1a0] sm:$0xff] }
  0x5d   : > { %v323_v59 = vld [vmem:[%s2509_s1 + $0x58] sm:$0xff]  ;;  %v1399_v62 = vpack.c.bf16 %v415_v58, %v413_v57  ;;  %v414_v0 = vld [vmem:[%s1955_s14 + $0x1b0] sm:$0xff]  ;;  %v447_v5 = vld [vmem:[%s2510_s2 + $0x28] sm:$0xff] }
  0x5e   : > { %1374 = vmatpush1.bf16.msra.mxu1 %v1373_v6  ;;  %765 = vmatpush1.msra.mxu0 %v440_v32  ;;  %v445_v60 = vld [vmem:[%s2510_s2 + $0x18] sm:$0xff]  ;;  %v446_v1 = vld [vmem:[%s2510_s2 + $0x20] sm:$0xff]  ;;  %v326_v4 = vld [vmem:[%s2509_s1 + $0x70] sm:$0xff]  ;;  %v1401_v6 = vpack.c.bf16 %v414_v0, %v412_v63 }
  0x5f   : > { %1376 = vmatprep.subr.bf16.mxu1 %v1375_v12  ;;  %1295 = vmatmul.mubr.msk.f32.vlgmr.msra.gmra.mrb[0].mxu0 %vm538_vm0, %v314_v35  ;;  %v417_v2 = vld [vmem:[%s1955_s14 + $0x1c8] sm:$0xff]  ;;  %v419_v3 = vld [vmem:[%s1955_s14 + $0x1d8] sm:$0xff]  ;;  %v416_v9 = vld [vmem:[%s1955_s14 + $0x1c0] sm:$0xff] }
  0x60   : > { %818 = vmatprep.mubr.f32.mxu0 %v1809_v8  ;;  %465 = vperm.xlu0 %1547, %v443_v56   ;;  %v1403_v7 = vpack.c.bf16 %v419_v3, %v417_v2  ;;  %v418_v10 = vld [vmem:[%s1955_s14 + $0x1d0] sm:$0xff]  ;;  %v421_v12 = vld [vmem:[%s1955_s14 + $0x1e8] sm:$0xff]  ;;  %v423_v13 = vld [vmem:[%s1955_s14 + $0x1f8] sm:$0xff] }
  0x61   : > { %475 = vperm.xlu1 %1548, %v445_v60   ;;  %v448_v11 = vld [vmem:[%s2510_s2 + $0x30] sm:$0xff]  ;;  %v329_v14 = vld [vmem:[%s2509_s1 + $0x88] sm:$0xff]  ;;  %v449_v15 = vld [vmem:[%s2510_s2 + $0x38] sm:$0xff]  ;;  %v1405_v16 = vpack.c.bf16 %v418_v10, %v416_v9  ;;  %v1407_v17 = vpack.c.bf16 %v423_v13, %v421_v12 }
  0x62   : > { %1378 = vmatpush1.bf16.msra.mxu1 %v1377_v20  ;;  %v420_v18 = vld [vmem:[%s1955_s14 + $0x1e0] sm:$0xff]  ;;  %v422_v19 = vld [vmem:[%s1955_s14 + $0x1f0] sm:$0xff]  ;;  %v335_v25 = vld [vmem:[%s2509_s1 + $0xb8] sm:$0xff] }
  0x63   : > { %1380 = vmatprep.subr.bf16.mxu1 %v1379_v22  ;;  %1296 = vmatmul.mubr.msk.f32.gmra.mrb[2].mxu0 %vm538_vm0, %v317_v42  ;;  %v450_v20 = vld [vmem:[%s2510_s2 + $0x40] sm:$0xff]  ;;  %v451_v22 = vld [vmem:[%s2510_s2 + $0x48] sm:$0xff]  ;;  %v1409_v23 = vpack.c.bf16 %v422_v19, %v420_v18  ;;  %v452_v24 = vld [vmem:[%s2510_s2 + $0x50] sm:$0xff] }
  0x64   : > { %824 = vmatprep.mubr.f32.mxu0 %v1809_v8  ;;  %480 = vperm.xlu0 %1547, %v446_v1   ;;  %v332_v21 = vld [vmem:[%s2509_s1 + $0xa0] sm:$0xff]  ;;  %v453_v26 = vld [vmem:[%s2510_s2 + $0x58] sm:$0xff]  ;;  %v338_v30 = vld [vmem:[%s2509_s1 + $0xd0] sm:$0xff] }
  0x65   : > { %485 = vperm.xlu1 %1548, %v447_v5   ;;  %v312_v27 = vld [vmem:[%s2509_s1] sm:$0xff]  ;;  %v455_v31 = vld [vmem:[%s2510_s2 + $0x68] sm:$0xff]  ;;  %v315_v32 = vld [vmem:[%s2509_s1 + $0x18] sm:$0xff] }
  0x66   : > { %1382 = vmatpush1.bf16.msra.mxu1 %v1381_v28  ;;  %v316_v28 = vld [vmem:[%s2509_s1 + $0x20] sm:$0xff]  ;;  %v319_v33 = vld [vmem:[%s2509_s1 + $0x38] sm:$0xff]  ;;  %v456_v34 = vld [vmem:[%s2510_s2 + $0x70] sm:$0xff] }
  0x67   : > { %1384 = vmatprep.subr.bf16.mxu1 %v1383_v29  ;;  %1297 = vmatmul.mubr.msk.f32.gmra.mrb[4].mxu0 %vm538_vm0, %v320_v49  ;;  %v454_v29 = vld [vmem:[%s2510_s2 + $0x60] sm:$0xff]  ;;  %v341_v35 = vld [vmem:[%s2509_s1 + $0xe8] sm:$0xff]  ;;  %v322_v38 = vld [vmem:[%s2509_s1 + $0x50] sm:$0xff] }
  0x68   : > { %830 = vmatprep.mubr.f32.mxu0 %v1809_v8  ;;  %490 = vperm.xlu0 %1547, %v448_v11   ;;  %v344_v39 = vld [vmem:[%s2509_s1 + $0x100] sm:$0xff]  ;;  %v321_v40 = vld [vmem:[%s2509_s1 + $0x48] sm:$0xff]  ;;  %v347_v42 = vld [vmem:[%s2509_s1 + $0x118] sm:$0xff] }
  0x69   : > { %495 = vperm.xlu1 %1548, %v449_v15   ;;  %v325_v41 = vld [vmem:[%s2509_s1 + $0x68] sm:$0xff]  ;;  %v350_v45 = vld [vmem:[%s2509_s1 + $0x130] sm:$0xff]  ;;  %v327_v46 = vld [vmem:[%s2509_s1 + $0x78] sm:$0xff] }
  0x6a   : > { %1386 = vmatpush1.bf16.msra.mxu1 %v1385_v36  ;;  %v457_v36 = vld [vmem:[%s2510_s2 + $0x78] sm:$0xff]  ;;  %v353_v48 = vld [vmem:[%s2509_s1 + $0x148] sm:$0xff]  ;;  %v330_v49 = vld [vmem:[%s2509_s1 + $0x90] sm:$0xff] }
  0x6b   : > { %1388 = vmatprep.subr.bf16.mxu1 %v1387_v37  ;;  %1298 = vmatmul.mubr.msk.f32.gmra.mrb[6].mxu0 %vm538_vm0, %v323_v59  ;;  %v318_v37 = vld [vmem:[%s2509_s1 + $0x30] sm:$0xff]  ;;  %v331_v47 = vld [vmem:[%s2509_s1 + $0x98] sm:$0xff]  ;;  %v333_v52 = vld [vmem:[%s2509_s1 + $0xa8] sm:$0xff] }
  0x6c   : > { %836 = vmatprep.mubr.f32.mxu0 %v1809_v8  ;;  %500 = vperm.xlu0 %1547, %v450_v20   ;;  %v334_v50 = vld [vmem:[%s2509_s1 + $0xb0] sm:$0xff]  ;;  %v359_v54 = vld [vmem:[%s2509_s1 + $0x178] sm:$0xff]  ;;  %v336_v55 = vld [vmem:[%s2509_s1 + $0xc0] sm:$0xff] }
  0x6d   : > { %505 = vperm.xlu1 %1548, %v451_v22   ;;  %v340_v56 = vld [vmem:[%s2509_s1 + $0xe0] sm:$0xff]  ;;  %v343_v57 = vld [vmem:[%s2509_s1 + $0xf8] sm:$0xff]  ;;  %v342_v58 = vld [vmem:[%s2509_s1 + $0xf0] sm:$0xff] }
  0x6e   : > { %1390 = vmatpush1.bf16.msra.mxu1 %v1389_v43  ;;  %v324_v43 = vld [vmem:[%s2509_s1 + $0x60] sm:$0xff]  ;;  %v346_v59 = vld [vmem:[%s2509_s1 + $0x110] sm:$0xff]  ;;  %v345_v60 = vld [vmem:[%s2509_s1 + $0x108] sm:$0xff] }
  0x6f   : > { %1392 = vmatprep.subr.bf16.mxu1 %v1391_v44  ;;  %1299 = vmatmul.mubr.msk.f32.gmra.mrb[8].mxu0 %vm538_vm0, %v326_v4  ;;  %v328_v44 = vld [vmem:[%s2509_s1 + $0x80] sm:$0xff]  ;;  %v351_v0 = vld [vmem:[%s2509_s1 + $0x138] sm:$0xff]  ;;  %v354_v2 = vld [vmem:[%s2509_s1 + $0x150] sm:$0xff] }
  0x70   : > { %842 = vmatprep.mubr.f32.mxu0 %v1809_v8  ;;  %510 = vperm.xlu0 %1547, %v452_v24   ;;  %v352_v63 = vld [vmem:[%s2509_s1 + $0x140] sm:$0xff]  ;;  %v355_v1 = vld [vmem:[%s2509_s1 + $0x158] sm:$0xff]  ;;  %v358_v3 = vld [vmem:[%s2509_s1 + $0x170] sm:$0xff] }
  0x71   : > { %515 = vperm.xlu1 %1548, %v453_v26   ;;  %v357_v4 = vld [vmem:[%s2509_s1 + $0x168] sm:$0xff] }
  0x72   : > { %1394 = vmatpush1.bf16.msra.mxu1 %v1393_v51  ;;  %v356_v51 = vld [vmem:[%s2509_s1 + $0x160] sm:$0xff] }
  0x73   : > { %1396 = vmatprep.subr.bf16.mxu1 %v1395_v53  ;;  %1300 = vmatmul.mubr.msk.f32.gmra.mrb[10].mxu0 %vm538_vm0, %v329_v14  ;;  %v337_v53 = vld [vmem:[%s2509_s1 + $0xc8] sm:$0xff] }
  0x74   : > { %848 = vmatprep.mubr.f32.mxu0 %v1809_v8  ;;  %520 = vperm.xlu0 %1547, %v454_v29  }
  0x75   : > { %525 = vperm.xlu1 %1548, %v455_v31  }
  0x76   : > { %1398 = vmatpush1.bf16.msra.mxu1 %v1397_v61  ;;  %v349_v61 = vld [vmem:[%s2509_s1 + $0x128] sm:$0xff] }
  0x77   : > { %1400 = vmatprep.subr.bf16.mxu1 %v1399_v62  ;;  %1301 = vmatmul.mubr.msk.f32.gmra.mrb[12].mxu0 %vm538_vm0, %v332_v21  ;;  %v348_v62 = vld [vmem:[%s2509_s1 + $0x120] sm:$0xff] }
  0x78   : > { %854 = vmatprep.mubr.f32.mxu0 %v1809_v8  ;;  %530 = vperm.xlu0 %1547, %v456_v34  }
  0x79   : > { %535 = vperm.xlu1 %1548, %v457_v36  }
  0x7a   : > { %1402 = vmatpush1.bf16.msra.mxu1 %v1401_v6 }
  0x7b   : > { %1404 = vmatprep.subr.bf16.mxu1 %v1403_v7  ;;  %1302 = vmatmul.mubr.msk.f32.gmra.mrb[14].mxu0 %vm538_vm0, %v335_v25 }
  0x7c   : > { %860 = vmatprep.mubr.f32.mxu0 %v1809_v8 }
  0x7e   : > { %1406 = vmatpush1.bf16.msra.mxu1 %v1405_v16 }
  0x7f   : > { %1408 = vmatprep.subr.bf16.mxu1 %v1407_v17  ;;  %1303 = vmatmul.mubr.msk.f32.gmra.mrb[16].mxu0 %vm538_vm0, %v338_v30 }
  0x80   : > { %866 = vmatprep.mubr.f32.mxu0 %v1809_v8 }
  0x82   : > { %1410 = vmatpush1.bf16.msra.mxu1 %v1409_v23 }
  0x83   : > { %1304 = vmatmul.mubr.msk.f32.gmra.mrb[18].mxu0 %vm538_vm0, %v341_v35 }
  0x84   : > { %872 = vmatprep.mubr.f32.mxu0 %v1809_v8 }
  0x85   : > { %652 = vmatmul.mubr.f32.vlgmr.msra.gmra.mrb[0].mxu1 %v312_v27 }
  0x86   : > { %657 = vmatprep.mubr.f32.mxu1 %v316_v28 }
  0x87   : > { %1305 = vmatmul.mubr.msk.f32.gmra.mrb[20].mxu0 %vm538_vm0, %v344_v39 }
  0x88   : > { %878 = vmatprep.mubr.f32.mxu0 %v1809_v8 }
  0x89   : > { %658 = vmatmul.mubr.f32.gmra.mrb[2].mxu1 %v315_v32 }
  0x8a   : > { %663 = vmatprep.mubr.f32.mxu1 %v319_v33 }
  0x8b   : > { %1306 = vmatmul.mubr.msk.f32.gmra.mrb[22].mxu0 %vm538_vm0, %v347_v42 }
  0x8c   : > { %884 = vmatprep.mubr.f32.mxu0 %v1809_v8 }
  0x8d   : > { %664 = vmatmul.mubr.f32.gmra.mrb[4].mxu1 %v318_v37 }
  0x8e   : > { %669 = vmatprep.mubr.f32.mxu1 %v322_v38 }
  0x8f   : > { %1307 = vmatmul.mubr.msk.f32.gmra.mrb[24].mxu0 %vm538_vm0, %v350_v45 }
  0x90   : > { %890 = vmatprep.mubr.f32.mxu0 %v1809_v8 }
  0x91   : > { %670 = vmatmul.mubr.f32.gmra.mrb[6].mxu1 %v321_v40 }
  0x92   : > { %675 = vmatprep.mubr.f32.mxu1 %v325_v41 }
  0x93   : > { %1308 = vmatmul.mubr.msk.f32.gmra.mrb[26].mxu0 %vm538_vm0, %v353_v48 }
  0x94   : > { %896 = vmatprep.mubr.f32.mxu0 %v1809_v8 }
  0x95   : > { %676 = vmatmul.mubr.f32.gmra.mrb[8].mxu1 %v324_v43 }
  0x96   : > { %681 = vmatprep.mubr.f32.mxu1 %v328_v44 }
  0x97   : > { %1309 = vmatmul.mubr.msk.f32.gmra.mrb[28].mxu0 %vm538_vm0, %v356_v51 }
  0x98   : > { %902 = vmatprep.mubr.f32.mxu0 %v1809_v8  ;;  %v339_v8 = vld [vmem:[%s2509_s1 + $0xd8] sm:$0xff] }
  0x99   : > { %682 = vmatmul.mubr.f32.gmra.mrb[10].mxu1 %v327_v46 }
  0x9a   : > { %687 = vmatprep.mubr.f32.mxu1 %v331_v47 }
  0x9b   : > { %1310 = vmatmul.mubr.msk.f32.gmra.mrb[30].mxu0 %vm538_vm0, %v359_v54 }
  0x9d   : > { %688 = vmatmul.mubr.f32.gmra.mrb[12].mxu1 %v330_v49 }
  0x9e   : > { %693 = vmatprep.mubr.f32.mxu1 %v334_v50 }
  0xa1   : > { %694 = vmatmul.mubr.f32.gmra.mrb[14].mxu1 %v333_v52 }
  0xa2   : > { %699 = vmatprep.mubr.f32.mxu1 %v337_v53 }
  0xa5   : > { %700 = vmatmul.mubr.f32.gmra.mrb[16].mxu1 %v336_v55 }
  0xa6   : > { %705 = vmatprep.mubr.f32.mxu1 %v340_v56 }
  0xa9   : > { %706 = vmatmul.mubr.f32.gmra.mrb[18].mxu1 %v339_v8 }
  0xaa   : > { %711 = vmatprep.mubr.f32.mxu1 %v343_v57 }
  0xad   : > { %712 = vmatmul.mubr.f32.gmra.mrb[20].mxu1 %v342_v58 }
  0xae   : > { %717 = vmatprep.mubr.f32.mxu1 %v346_v59 }
  0xb1   : > { %718 = vmatmul.mubr.f32.gmra.mrb[22].mxu1 %v345_v60 }
  0xb2   : > { %723 = vmatprep.mubr.f32.mxu1 %v349_v61 }
  0xb5   : > { %724 = vmatmul.mubr.f32.gmra.mrb[24].mxu1 %v348_v62 }
  0xb6   : > { %729 = vmatprep.mubr.f32.mxu1 %v352_v63 }
  0xb9   : > { %730 = vmatmul.mubr.f32.gmra.mrb[26].mxu1 %v351_v0 }
  0xba   : > { %735 = vmatprep.mubr.f32.mxu1 %v355_v1 }
  0xbd   : > { %736 = vmatmul.mubr.f32.gmra.mrb[28].mxu1 %v354_v2 }
  0xbe   : > { %741 = vmatprep.mubr.f32.mxu1 %v358_v3 }
  0xc1   : > { %742 = vmatmul.mubr.f32.gmra.mrb[30].mxu1 %v357_v4 }
  0xdb   : > { %v461_v20 = vpop.permute.xlu0 %460  ;;  %v471_v37 = vpop.permute.xlu1 %470 }
  0xdf   : > { %v466_v27 = vpop.permute.xlu0 %465 }
  0xe0   : > { %v476_v52 = vpop.permute.xlu1 %475 }
  0xe3   : > { %v481_v62 = vpop.permute.xlu0 %480 }
 0x132   : > { %v814_v5 = vpop.f32.mrb[0].mxu0 }
 0x133   : > { %v816_v6 = vpop.f32.mrb[1].mxu0 }
 0x136   : > { %v820_v7 = vpop.f32.mrb[2].mxu0 }
 0x137   : > { %v822_v9 = vpop.f32.mrb[3].mxu0 }
 0x13a   : > { %v826_v10 = vpop.f32.mrb[4].mxu0 }
 0x13b   : > { %v828_v11 = vpop.f32.mrb[5].mxu0 }
 0x13e   : > { %v832_v12 = vpop.f32.mrb[6].mxu0 }
 0x13f   : > { %v834_v13 = vpop.f32.mrb[7].mxu0 }
 0x142   : > { %v2267_v14 = vpop.f32.mrb[8].mxu0 }
 0x143   : > { %v2269_v15 = vpop.f32.mrb[9].mxu0 }
 0x146   : > { %v2271_v16 = vpop.f32.mrb[10].mxu0 }
 0x147   : > { %v2273_v17 = vpop.f32.mrb[11].mxu0 }
 0x14a   : > { %v2275_v18 = vpop.f32.mrb[12].mxu0 }
 0x14b   : > { %v2277_v19 = vpop.f32.mrb[13].mxu0 }
 0x14e   : > { %v2279_v21 = vpop.f32.mrb[14].mxu0 }
 0x14f   : > { %v2281_v22 = vpop.f32.mrb[15].mxu0 }
 0x152   : > { %v2283_v28 = vpop.f32.mrb[16].mxu0 }
 0x153   : > { %v2285_v30 = vpop.f32.mrb[17].mxu0 }
 0x156   : > { %v2287_v39 = vpop.f32.mrb[18].mxu0 }
 0x157   : > { %v2289_v41 = vpop.f32.mrb[19].mxu0 }
 0x158   : > { %v653_v23 = vpop.f32.mrb[0].mxu1 }
 0x159   : > { %v654_v24 = vadd.f32 %v653_v23, %v461_v20  ;;  %v655_v25 = vpop.f32.mrb[1].mxu1  ;;  %v486_v23 = vpop.permute.xlu1 %485 }
 0x15a   : > { %v656_v26 = vadd.f32 %v655_v25, %v461_v20  ;;  %v2291_v49 = vpop.f32.mrb[20].mxu0 }
 0x15b   : > { %v815_v29 = vadd.f32 %v814_v5, %v654_v24  ;;  %v2293_v51 = vpop.f32.mrb[21].mxu0 }
 0x15c   : > { %v817_v31 = vadd.f32 %v816_v6, %v656_v26  ;;  %v659_v32 = vpop.f32.mrb[2].mxu1 }
 0x15d   : > { %v1311_v33 = vmul.f32 -1.442695, %v815_v29  ;;  %v660_v34 = vadd.f32 %v659_v32, %v466_v27  ;;  %v661_v35 = vpop.f32.mrb[3].mxu1 }
 0x15e   : > { %v1312_v36 = vmul.f32 -1.442695, %v817_v31  ;;  %v662_v38 = vadd.f32 %v661_v35, %v466_v27  ;;  %v2295_v59 = vpop.f32.mrb[22].mxu0 }
 0x15f   : > { %1549 = vpow2.f32 %v1311_v33  ;;  %v821_v40 = vadd.f32 %v820_v7, %v660_v34  ;;  %v2297_v61 = vpop.f32.mrb[23].mxu0 }
 0x160   : > { %1551 = vpow2.f32 %v1312_v36  ;;  %v823_v42 = vadd.f32 %v822_v9, %v662_v38  ;;  %v665_v43 = vpop.f32.mrb[4].mxu1 }
 0x161   : > { %v1313_v44 = vmul.f32 -1.442695, %v821_v40  ;;  %v666_v45 = vadd.f32 %v665_v43, %v471_v37  ;;  %v667_v46 = vpop.f32.mrb[5].mxu1 }
 0x162   : > { %v1314_v47 = vmul.f32 -1.442695, %v823_v42  ;;  %v668_v48 = vadd.f32 %v667_v46, %v471_v37  ;;  %v491_v37 = vpop.permute.xlu0 %490 }
 0x163   : > { %1553 = vpow2.f32 %v1313_v44  ;;  %v827_v50 = vadd.f32 %v826_v10, %v666_v45  ;;  %v2299_v10 = vpop.f32.mrb[24].mxu0 }
 0x164   : > { %1555 = vpow2.f32 %v1314_v47  ;;  %v829_v53 = vadd.f32 %v828_v11, %v668_v48  ;;  %v671_v54 = vpop.f32.mrb[6].mxu1 }
 0x165   : > { %v1315_v55 = vmul.f32 -1.442695, %v827_v50  ;;  %v672_v56 = vadd.f32 %v671_v54, %v476_v52  ;;  %v673_v8 = vpop.f32.mrb[7].mxu1  ;;  %v496_v54 = vpop.permute.xlu1 %495 }
 0x166   : > { %v1316_v57 = vmul.f32 -1.442695, %v829_v53  ;;  %v674_v58 = vadd.f32 %v673_v8, %v476_v52 }
 0x167   : > { %1557 = vpow2.f32 %v1315_v55  ;;  %v833_v60 = vadd.f32 %v832_v12, %v672_v56  ;;  %v2302_v12 = vpop.f32.mrb[25].mxu0 }
 0x168   : > { %1559 = vpow2.f32 %v1316_v57  ;;  %v835_v63 = vadd.f32 %v834_v13, %v674_v58  ;;  %v677_v0 = vpop.f32.mrb[8].mxu1  ;;  %v2305_v35 = vpop.f32.mrb[26].mxu0 }
 0x169   : > { %v1550_v1 = vpop.eup %1549  ;;  %v1317_v2 = vmul.f32 -1.442695, %v833_v60  ;;  %v678_v3 = vadd.f32 %v677_v0, %v481_v62  ;;  %v679_v4 = vpop.f32.mrb[9].mxu1 }
 0x16a   : > { %v1552_v5 = vpop.eup %1551  ;;  %v933_v6 = vadd.f32 1.0, %v1550_v1  ;;  %v1318_v7 = vmul.f32 -1.442695, %v835_v63  ;;  %v680_v9 = vadd.f32 %v679_v4, %v481_v62  ;;  %v2308_v36 = vpop.f32.mrb[27].mxu0 }
 0x16b   : > { %1561 = vpow2.f32 %v1317_v2  ;;  %v839_v11 = vadd.f32 %v2267_v14, %v678_v3  ;;  %v934_v20 = vadd.f32 1.0, %v1552_v5  ;;  %v2311_v52 = vpop.f32.mrb[28].mxu0  ;;  %v501_v4 = vpop.permute.xlu0 %500 }
 0x16c   : > { %v841_v13 = vadd.f32 %v2269_v15, %v680_v9  ;;  %v683_v24 = vpop.f32.mrb[10].mxu1  ;;  %1563 = vrcp.f32 %v933_v6  ;;  %v2314_v53 = vpop.f32.mrb[29].mxu0 }
 0x16d   : > { %v1554_v25 = vpop.eup %1553  ;;  %v1319_v26 = vmul.f32 -1.442695, %v839_v11  ;;  %v684_v27 = vadd.f32 %v683_v24, %v486_v23  ;;  %v685_v29 = vpop.f32.mrb[11].mxu1  ;;  %1565 = vpow2.f32 %v1318_v7 }
 0x16e   : > { %v1556_v31 = vpop.eup %1555  ;;  %v935_v32 = vadd.f32 1.0, %v1554_v25  ;;  %v1320_v33 = vmul.f32 -1.442695, %v841_v13  ;;  %v686_v34 = vadd.f32 %v685_v29, %v486_v23  ;;  %v2317_v1 = vpop.f32.mrb[30].mxu0 }
 0x16f   : > { %1567 = vpow2.f32 %v1319_v26  ;;  %v845_v14 = vadd.f32 %v2271_v16, %v684_v27  ;;  %v936_v15 = vadd.f32 1.0, %v1556_v31  ;;  %v2322_v3 = vpop.f32.mrb[31].mxu0 }
 0x170   : > { %1569 = vrcp.f32 %v934_v20  ;;  %v847_v38 = vadd.f32 %v2273_v17, %v686_v34  ;;  %v689_v40 = vpop.f32.mrb[12].mxu1 }
 0x171   : > { %v1558_v42 = vpop.eup %1557  ;;  %1571 = vrcp.f32 %v935_v32  ;;  %v1321_v43 = vmul.f32 -1.442695, %v845_v14  ;;  %v690_v44 = vadd.f32 %v689_v40, %v491_v37  ;;  %v691_v45 = vpop.f32.mrb[13].mxu1 }
 0x172   : > { %v1560_v46 = vpop.eup %1559  ;;  %v937_v47 = vadd.f32 1.0, %v1558_v42  ;;  %1573 = vpow2.f32 %v1320_v33  ;;  %v1322_v48 = vmul.f32 -1.442695, %v847_v38  ;;  %v692_v50 = vadd.f32 %v691_v45, %v491_v37 }
 0x173   : > { %1575 = vpow2.f32 %v1321_v43  ;;  %v851_v16 = vadd.f32 %v2275_v18, %v690_v44  ;;  %v938_v17 = vadd.f32 1.0, %v1560_v46 }
 0x174   : > { %1577 = vrcp.f32 %v936_v15  ;;  %v853_v55 = vadd.f32 %v2277_v19, %v692_v50  ;;  %v695_v56 = vpop.f32.mrb[14].mxu1 }
 0x175   : > { %v1562_v8 = vpop.eup %1561  ;;  %1579 = vrcp.f32 %v937_v47  ;;  %v1323_v57 = vmul.f32 -1.442695, %v851_v16  ;;  %v696_v58 = vadd.f32 %v695_v56, %v496_v54  ;;  %v697_v60 = vpop.f32.mrb[15].mxu1 }
 0x176   : > { %v939_v62 = vadd.f32 1.0, %v1562_v8  ;;  %1581 = vpow2.f32 %v1322_v48  ;;  %v1324_v63 = vmul.f32 -1.442695, %v853_v55  ;;  %v698_v0 = vadd.f32 %v697_v60, %v496_v54  ;;  %v2319_v18 = vpop.eup %1563 }
 0x177   : > { %1583 = vpow2.f32 %v1323_v57  ;;  %v857_v2 = vadd.f32 %v2279_v21, %v696_v58  ;;  %v1566_v19 = vpop.eup %1565 }
 0x178   : > { %1585 = vrcp.f32 %v938_v17  ;;  %v859_v5 = vadd.f32 %v2281_v22, %v698_v0  ;;  %v701_v6 = vpop.f32.mrb[16].mxu1  ;;  %v940_v9 = vadd.f32 1.0, %v1566_v19  ;;  %v506_v22 = vpop.permute.xlu1 %505 }
 0x179   : > { %v1568_v7 = vpop.eup %1567  ;;  %1587 = vpow2.f32 %v1324_v63  ;;  %v1325_v11 = vmul.f32 -1.442695, %v857_v2  ;;  %v702_v20 = vadd.f32 %v701_v6, %v501_v4  ;;  %v703_v23 = vpop.f32.mrb[17].mxu1 }
 0x17a   : > { %v2325_v13 = vpop.eup %1569  ;;  %1589 = vrcp.f32 %v939_v62  ;;  %v981_v24 = vadd.f32 1.0, %v1568_v7  ;;  %v1326_v25 = vmul.f32 -1.442695, %v859_v5  ;;  %v704_v21 = vadd.f32 %v703_v23, %v501_v4 }
 0x17b   : > { %v2327_v26 = vpop.eup %1571  ;;  %1591 = vrcp.f32 %v940_v9  ;;  %v863_v27 = vadd.f32 %v2283_v28, %v702_v20 }
 0x17c   : > { %v1574_v29 = vpop.eup %1573  ;;  %1593 = vrcp.f32 %v981_v24  ;;  %v865_v31 = vadd.f32 %v2285_v30, %v704_v21  ;;  %v707_v32 = vpop.f32.mrb[18].mxu1 }
 0x17d   : > { %v1576_v33 = vpop.eup %1575  ;;  %v982_v34 = vadd.f32 1.0, %v1574_v29  ;;  %1595 = vpow2.f32 %v1325_v11  ;;  %v708_v14 = vadd.f32 %v707_v32, %v506_v22  ;;  %v709_v15 = vpop.f32.mrb[19].mxu1 }
 0x17e   : > { %v2331_v37 = vpop.eup %1577  ;;  %v983_v38 = vadd.f32 1.0, %v1576_v33  ;;  %1597 = vpow2.f32 %v1326_v25  ;;  %v710_v40 = vadd.f32 %v709_v15, %v506_v22  ;;  %v511_v30 = vpop.permute.xlu0 %510 }
 0x17f   : > { %v2333_v42 = vpop.eup %1579  ;;  %1599 = vrcp.f32 %v982_v34  ;;  %v869_v28 = vadd.f32 %v2287_v39, %v708_v14 }
 0x180   : > { %v1582_v43 = vpop.eup %1581  ;;  %1601 = vrcp.f32 %v983_v38  ;;  %v871_v44 = vadd.f32 %v2289_v41, %v710_v40  ;;  %v713_v45 = vpop.f32.mrb[20].mxu1  ;;  %v1064_v40 = vld [vmem:[%s2349_s10 + $0x18] sm:$0xff] }
 0x181   : > { %v1584_v46 = vpop.eup %1583  ;;  %v984_v47 = vadd.f32 1.0, %v1582_v43  ;;  %1603 = vtanh.f32 %v863_v27  ;;  %v714_v48 = vadd.f32 %v713_v45, %v511_v30  ;;  %v715_v50 = vpop.f32.mrb[21].mxu1 }
 0x182   : > { %v2340_v16 = vpop.eup %1585  ;;  %v985_v17 = vadd.f32 1.0, %v1584_v46  ;;  %1605 = vtanh.f32 %v865_v31  ;;  %v716_v54 = vadd.f32 %v715_v50, %v511_v30  ;;  %v516_v41 = vpop.permute.xlu1 %515  ;;  %v1063_v31 = vld [vmem:[%s2349_s10 + $0x10] sm:$0xff]  ;;  %v1065_v46 = vld [vmem:[%s2349_s10 + $0x20] sm:$0xff] }
 0x183   : > { %v1588_v55 = vpop.eup %1587  ;;  %1607 = vrcp.f32 %v984_v47  ;;  %v875_v39 = vadd.f32 %v2291_v49, %v714_v48  ;;  %v1061_v49 = vld [vmem:[%s2349_s10] sm:$0xff]  ;;  %v521_v6 = vpop.permute.xlu0 %520  ;;  %v1066_v47 = vld [vmem:[%s2349_s10 + $0x28] sm:$0xff] }
 0x184   : > { %v2343_v56 = vpop.eup %1589  ;;  %1609 = vrcp.f32 %v985_v17  ;;  %v986_v8 = vadd.f32 1.0, %v1588_v55  ;;  %v877_v57 = vadd.f32 %v2293_v51, %v716_v54  ;;  %v719_v58 = vpop.f32.mrb[22].mxu1  ;;  %v1062_v51 = vld [vmem:[%s2349_s10 + $0x8] sm:$0xff] }
 0x185   : > { %v2346_v60 = vpop.eup %1591  ;;  %1611 = vtanh.f32 %v869_v28  ;;  %v720_v62 = vadd.f32 %v719_v58, %v516_v41  ;;  %v721_v63 = vpop.f32.mrb[23].mxu1 }
 0x186   : > { %v1594_v0 = vpop.eup %1593  ;;  %1613 = vrcp.f32 %v986_v8  ;;  %v722_v2 = vadd.f32 %v721_v63, %v516_v41 }
 0x187   : > { %v1596_v19 = vpop.eup %1595  ;;  %1615 = vtanh.f32 %v871_v44  ;;  %v881_v4 = vadd.f32 %v2295_v59, %v720_v62  ;;  %v1069_v27 = vmul.f32 %v1594_v0, %v1061_v49  ;;  %v1067_v49 = vld [vmem:[%s2349_s10 + $0x30] sm:$0xff] }
 0x188   : > { %v1598_v5 = vpop.eup %1597  ;;  %v987_v7 = vadd.f32 1.0, %v1596_v19  ;;  %1617 = vtanh.f32 %v875_v39  ;;  %v883_v9 = vadd.f32 %v2297_v61, %v722_v2  ;;  %v725_v11 = vpop.f32.mrb[24].mxu1 }
 0x189   : > { %v1600_v20 = vpop.eup %1599  ;;  %v988_v23 = vadd.f32 1.0, %v1598_v5  ;;  %1619 = vtanh.f32 %v877_v57  ;;  %v726_v24 = vadd.f32 %v725_v11, %v521_v6  ;;  %v727_v25 = vpop.f32.mrb[25].mxu1 }
 0x18a   : > { %v1602_v21 = vpop.eup %1601  ;;  %1621 = vrcp.f32 %v987_v7  ;;  %v728_v29 = vadd.f32 %v727_v25, %v521_v6  ;;  %v1070_v22 = vmul.f32 %v1600_v20, %v1062_v51  ;;  %v526_v61 = vpop.permute.xlu1 %525  ;;  %v1068_v6 = vld [vmem:[%s2349_s10 + $0x38] sm:$0xff] }
 0x18b   : > { %v1604_v59 = vpop.eup %1603  ;;  %1623 = vrcp.f32 %v988_v23  ;;  %v887_v32 = vadd.f32 %v2299_v10, %v726_v24  ;;  %v1071_v45 = vmul.f32 %v1602_v21, %v1063_v31  ;;  %v531_v39 = vpop.permute.xlu0 %530 }
 0x18c   : > { %v1606_v33 = vpop.eup %1605  ;;  %v1077_v34 = vmul.f32 %v1604_v59, %v2319_v18  ;;  %1625 = vtanh.f32 %v881_v4  ;;  %v889_v14 = vadd.f32 %v2302_v12, %v728_v29  ;;  %v731_v15 = vpop.f32.mrb[26].mxu1 }
 0x18d   : > { %v1608_v38 = vpop.eup %1607  ;;  %v1078_v28 = vmul.f32 %v1606_v33, %v2325_v13  ;;  %1627 = vtanh.f32 %v883_v9  ;;  %v1327_v43 = vmul.f32 -1.442695, %v887_v32  ;;  %v732_v30 = vadd.f32 %v731_v15, %v526_v61  ;;  %v733_v44 = vpop.f32.mrb[27].mxu1 }
 0x18e   : > { %v1610_v10 = vpop.eup %1609  ;;  %v1085_v48 = vadd.f32 %v1077_v34, %v1069_v27  ;;  %v1328_v50 = vmul.f32 -1.442695, %v889_v14  ;;  %v734_v18 = vadd.f32 %v733_v44, %v526_v61  ;;  %v1072_v13 = vmul.f32 %v1608_v38, %v1064_v40 }
 0x18f   : > { %v1612_v17 = vpop.eup %1611  ;;  %v1086_v54 = vadd.f32 %v1078_v28, %v1070_v22  ;;  %1629 = vpow2.f32 %v1327_v43  ;;  %v893_v12 = vadd.f32 %v2305_v35, %v732_v30  ;;  %v1073_v62 = vmul.f32 %v1610_v10, %v1065_v46 }
 0x190   : > { %v1614_v55 = vpop.eup %1613  ;;  %1109 = vst [vmem:[%s2365_s11] sm:$0xff] %v1085_v48  ;;  %v1079_v41 = vmul.f32 %v1612_v17, %v2327_v26  ;;  %v895_v8 = vadd.f32 %v2308_v36, %v734_v18  ;;  %v737_v57 = vpop.f32.mrb[28].mxu1  ;;  %1631 = vpow2.f32 %v1328_v50 }
 0x191   : > { %v1616_v58 = vpop.eup %1615  ;;  %v1074_v63 = vmul.f32 %v1614_v55, %v1066_v47  ;;  %1110 = vst [vmem:[%s2365_s11 + $0x8] sm:$0xff] %v1086_v54  ;;  %v1329_v35 = vmul.f32 -1.442695, %v893_v12  ;;  %v738_v0 = vadd.f32 %v737_v57, %v531_v39  ;;  %v739_v2 = vpop.f32.mrb[29].mxu1 }
 0x192   : > { %v1618_v19 = vpop.eup %1617  ;;  %v1087_v4 = vadd.f32 %v1079_v41, %v1071_v45  ;;  %v1080_v5 = vmul.f32 %v1616_v58, %v2331_v37  ;;  %v1330_v51 = vmul.f32 -1.442695, %v895_v8  ;;  %v740_v7 = vadd.f32 %v739_v2, %v531_v39 }
 0x193   : > { %v1620_v26 = vpop.eup %1619  ;;  %v1081_v36 = vmul.f32 %v1618_v19, %v2333_v42  ;;  %1633 = vpow2.f32 %v1329_v35  ;;  %v899_v9 = vadd.f32 %v2311_v52, %v738_v0  ;;  %v536_v52 = vpop.permute.xlu1 %535 }
 0x194   : > { %v1622_v11 = vpop.eup %1621  ;;  %1111 = vst [vmem:[%s2365_s11 + $0x10] sm:$0xff] %v1087_v4  ;;  %v1088_v20 = vadd.f32 %v1080_v5, %v1072_v13  ;;  %v1082_v23 = vmul.f32 %v1620_v26, %v2340_v16  ;;  %v743_v24 = vpop.f32.mrb[30].mxu1  ;;  %1635 = vpow2.f32 %v1330_v51  ;;  %v901_v16 = vadd.f32 %v2314_v53, %v740_v7 }
 0x195   : > { %v1624_v25 = vpop.eup %1623  ;;  %v1075_v37 = vmul.f32 %v1622_v11, %v1067_v49  ;;  %v2378_v21 = vadd.f32 %v1081_v36, %v1073_v62  ;;  %v1331_v42 = vmul.f32 -1.442695, %v899_v9  ;;  %v745_v27 = vpop.f32.mrb[31].mxu1  ;;  %1637 = vtanh.f32 %v1085_v48 }
 0x196   : > { %v1626_v29 = vpop.eup %1625  ;;  %v1076_v59 = vmul.f32 %v1624_v25, %v1068_v6  ;;  %1112 = vst [vmem:[%s2365_s11 + $0x18] sm:$0xff] %v1088_v20  ;;  %v2381_v22 = vadd.f32 %v1082_v23, %v1074_v63  ;;  %v744_v33 = vadd.f32 %v743_v24, %v536_v52  ;;  %v746_v61 = vadd.f32 %v745_v27, %v536_v52 }
 0x197   : > { %v1628_v31 = vpop.eup %1627  ;;  %1113 = vst [vmem:[%s2365_s11 + $0x20] sm:$0xff] %v2378_v21  ;;  %v1083_v32 = vmul.f32 %v1626_v29, %v2343_v56  ;;  %1639 = vtanh.f32 %v1086_v54  ;;  %v1332_v14 = vmul.f32 -1.442695, %v901_v16 }
 0x198   : > { %1114 = vst [vmem:[%s2365_s11 + $0x28] sm:$0xff] %v2381_v22  ;;  %v1084_v34 = vmul.f32 %v1628_v31, %v2346_v60  ;;  %1641 = vpow2.f32 %v1331_v42  ;;  %v905_v38 = vadd.f32 %v2317_v1, %v744_v33  ;;  %v907_v56 = vadd.f32 %v2322_v3, %v746_v61 }
 0x199   : > { %v1630_v53 = vpop.eup %1629  ;;  %v2392_v15 = vadd.f32 %v1083_v32, %v1075_v37  ;;  %1643 = vpow2.f32 %v1332_v14 }
 0x19a   : > { %v2396_v40 = vadd.f32 %v1084_v34, %v1076_v59  ;;  %v1037_v28 = vadd.f32 1.0, %v1630_v53  ;;  %1645 = vtanh.f32 %v1087_v4  ;;  %v1333_v1 = vmul.f32 -1.442695, %v905_v38  ;;  %v1632_v3 = vpop.eup %1631 }
 0x19b   : > { %1115 = vst [vmem:[%s2365_s11 + $0x30] sm:$0xff] %v2392_v15  ;;  %1647 = vtanh.f32 %v1088_v20  ;;  %v1038_v43 = vadd.f32 1.0, %v1632_v3  ;;  %v1334_v30 = vmul.f32 -1.442695, %v907_v56 }
 0x19c   : > { %1116 = vst [vmem:[%s2365_s11 + $0x38] sm:$0xff] %v2396_v40  ;;  %1649 = vrcp.f32 %v1037_v28 }
 0x19d   : > { %v1634_v60 = vpop.eup %1633 }
 0x19e   : > { %1718 = shalt.err (!%p1715_p12)
}
 0x19f   : > { %s1719_s14 = scalar_lea.hbm %s2403_s13, 1024  ;;  %s1723_s11 = scalar_lea.hbm %s2513_s5, 2048 }
 0x1a0   : > { %p1720_p13 = scmp.ne.s32.totalorder %s2403_s13, %s1719_s14  ;;  %p1724_p5 = scmp.lt.u32.totalorder %s2403_s13, %s2513_s5 }
 0x1a1   : > { %p1725_p9 = scmp.lt.u32.totalorder %s1723_s11, %s1719_s14  ;;  %p1727_p6 = scmp.lt.u32.totalorder %s1719_s14, %s2403_s13 }
 0x1a2   : > { %p1721_p1 = pnand %p1720_p13, %p2520_p11 }
 0x1a3   : > { %p1726_p10 = por %p1725_p9, %p1724_p5 }
 0x1a4   : > { %p1722_p2 = pneg %p1721_p1 }
 0x1a5   : > { %p1728_p0 = por %p1727_p6, %p1726_p10 }
 0x1a7   : > { %p1729_p3 = pnand %p1728_p0, %p1722_p2 }
 0x1a9   : > { %1732 = shalt.err (!%p1729_p3)
}
 0x1aa   : > { %s1812_s17 = smov 256   ;;  %s1813_s23 = smov 512   ;;  %v1039_v44 = vadd.f32 1.0, %v1634_v60  ;;  %1651 = vpow2.f32 %v1333_v1  ;;  %v1636_v10 = vpop.eup %1635 }
 0x1ab   : > { %s1814_s25 = smov 16   ;;  %1653 = vrcp.f32 %v1038_v43  ;;  %v1040_v45 = vadd.f32 1.0, %v1636_v10  ;;  %v1638_v46 = vpop.eup %1637  ;;  %s2458_s26 = scalar_lea.hbm %s2512_s4, %s1345_s7 }
 0x1ac   : > { %1496 = dma.vmem_to_hbm [thread:$0]  (%p2520_p11), %s2405_s12, 1024, %s2403_s13, %s1131_s16, %s1812_s17, %s1813_s23, %s1814_s25   ;;  %1655 = vrcp.f32 %v1039_v44  ;;  %v1640_v47 = vpop.eup %1639 }
 0x1ad   : > { %1657 = vpow2.f32 %v1334_v30  ;;  %v1642_v48 = vpop.eup %1641  ;;  %s2442_s12 = scalar_lea.vmem [#allocation6], %s2338_s9  ;;  %s1126_s14 = scalar_lea.sflag [#allocation4], %s1951_s28 }
 0x1ae   : > { %1659 = vrcp.f32 %v1040_v45  ;;  %v1644_v50 = vpop.eup %1643  ;;  %v1041_v18 = vadd.f32 1.0, %v1642_v48  ;;  %s1144_s9 = sshll.u32 %s2442_s12, 4  ;;  %s1815_s10 = smov [#allocation6]   ;;  %s2460_s9 = int_to_ptr.vmem [resolvable:$true] %s1144_s9 }
 0x1af   : > { %1661 = vtanh.f32 %v2378_v21  ;;  %v1646_v17 = vpop.eup %1645  ;;  %v1042_v54 = vadd.f32 1.0, %v1644_v50  ;;  %s1733_s8 = scalar_lea.vmem %s2460_s9, 1024  ;;  %s1737_s11 = sshll.u32 %s1815_s10, 4  ;;  %s1738_s11 = int_to_ptr.vmem [resolvable:$false] %s1737_s11 }
 0x1b0   : > { %1663 = vtanh.f32 %v2381_v22  ;;  %v1648_v12 = vpop.eup %1647  ;;  %p1734_p4 = scmp.ne.s32.totalorder %s2460_s9, %s1733_s8  ;;  %s1739_s22 = scalar_lea.vmem %s1738_s11, 2048 }
 0x1b1   : > { %1665 = vrcp.f32 %v1041_v18  ;;  %v1650_v55 = vpop.eup %1649  ;;  %p1740_p12 = scmp.lt.s32.totalorder %s2460_s9, %s1738_s11  ;;  %p1741_p13 = scmp.lt.s32.totalorder %s1739_s22, %s1733_s8 }
 0x1b2   : > { %1667 = vrcp.f32 %v1042_v54  ;;  %v1101_v39 = vmul.f32 %v1650_v55, %v1638_v46  ;;  %p1735_p7 = pnand %p1734_p4, %p2520_p11 }
 0x1b3   : > { %1669 = vtanh.f32 %v2392_v15  ;;  %p1742_p1 = por %p1741_p13, %p1740_p12 }
 0x1b4   : > { %v1652_v13 = vpop.eup %1651  ;;  %1117 = vst [vmem:[%s2442_s12] sm:$0xff] %v1101_v39  ;;  %p1736_p8 = pneg %p1735_p7 }
 0x1b5   : > { %v1654_v41 = vpop.eup %1653  ;;  %v1043_v8 = vadd.f32 1.0, %v1652_v13 }
 0x1b6   : > { %v1656_v57 = vpop.eup %1655  ;;  %v1102_v58 = vmul.f32 %v1654_v41, %v1640_v47  ;;  %p1743_p2 = pnand %p1742_p1, %p1736_p8 }
 0x1b7   : > { %v1658_v62 = vpop.eup %1657  ;;  %v1103_v63 = vmul.f32 %v1656_v57, %v1646_v17  ;;  %1671 = vrcp.f32 %v1043_v8 }
 0x1b8   : > { %v1660_v35 = vpop.eup %1659  ;;  %1118 = vst [vmem:[%s2442_s12 + $0x8] sm:$0xff] %v1102_v58  ;;  %v1044_v0 = vadd.f32 1.0, %v1658_v62  ;;  %1673 = vtanh.f32 %v2396_v40 }
 0x1b9   : > { %1119 = vst [vmem:[%s2442_s12 + $0x10] sm:$0xff] %v1103_v63  ;;  %v1104_v2 = vmul.f32 %v1660_v35, %v1648_v12  ;;  %v1662_v19 = vpop.eup %1661 }
 0x1ba   : > { %1675 = vrcp.f32 %v1044_v0  ;;  %v1664_v49 = vpop.eup %1663 }
 0x1bb   : > { %1120 = vst [vmem:[%s2442_s12 + $0x18] sm:$0xff] %v1104_v2  ;;  %v1666_v4 = vpop.eup %1665 }
 0x1bc   : > { %v1668_v5 = vpop.eup %1667  ;;  %v1105_v51 = vmul.f32 %v1666_v4, %v1662_v19 }
 0x1bd   : > { %v1106_v26 = vmul.f32 %v1668_v5, %v1664_v49  ;;  %v1670_v6 = vpop.eup %1669 }
 0x1be   : > { %1121 = vst [vmem:[%s2442_s12 + $0x20] sm:$0xff] %v1105_v51 }
 0x1bf   : > { %1122 = vst [vmem:[%s2442_s12 + $0x28] sm:$0xff] %v1106_v26 }
 0x1c1   : > { %v1672_v36 = vpop.eup %1671 }
 0x1c2   : > { %v1107_v7 = vmul.f32 %v1672_v36, %v1670_v6  ;;  %v1674_v9 = vpop.eup %1673 }
 0x1c4   : > { %v1676_v11 = vpop.eup %1675  ;;  %1123 = vst [vmem:[%s2442_s12 + $0x30] sm:$0xff] %v1107_v7 }
 0x1c5   : > { %v1108_v20 = vmul.f32 %v1676_v11, %v1674_v9 }
 0x1c7   : > { %1124 = vst [vmem:[%s2442_s12 + $0x38] sm:$0xff] %v1108_v20 }
 0x1c8   : > { %1746 = shalt.err (!%p1743_p2)
}
 0x1c9   : > { %s1747_s7 = scalar_lea.hbm %s2458_s26, 1024  ;;  %s1751_s12 = scalar_lea.hbm %s2512_s4, 2048 }
 0x1ca   : > { %p1748_p5 = scmp.ne.s32.totalorder %s2458_s26, %s1747_s7  ;;  %p1752_p6 = scmp.lt.u32.totalorder %s2458_s26, %s2512_s4 }
 0x1cb   : > { %p1753_p0 = scmp.lt.u32.totalorder %s1751_s12, %s1747_s7  ;;  %p1755_p4 = scmp.lt.u32.totalorder %s1747_s7, %s2458_s26 }
 0x1cc   : > { %p1749_p9 = pnand %p1748_p5, %p2520_p11 }
 0x1cd   : > { %p1754_p3 = por %p1753_p0, %p1752_p6 }
 0x1ce   : > { %p1750_p10 = pneg %p1749_p9 }
 0x1cf   : > { %p1756_p7 = por %p1755_p4, %p1754_p3 }
 0x1d1   : > { %p1757_p8 = pnand %p1756_p7, %p1750_p10 }
 0x1d3   : > { %1760 = shalt.err (!%p1757_p8)
}
 0x1d4   : > { %1495 = dma.vmem_to_hbm [thread:$0]  (%p2520_p11), %s2460_s9, 1024, %s2458_s26, %s1126_s14, %s1812_s17, %s1813_s23, %s1814_s25  }
 0x1d5 PF: > { %s1175_s8 = sand.u32 1, %s1791_s18   ;;  %p2521_p12 = scmp.ne.s32.totalorder %s2519_s6, 0 }
 0x1d6   : > { %p2522_p13 = scmp.ge.s32.totalorder %s1803_s21, 2  ;;  %s1176_s10 = scalar_lea.sflag [#allocation4], %s1175_s8 }
 0x1d8   : > { %p1500_p1 = pnand %p2522_p13, %p2521_p12 }
 0x1da   : > { %1782 = dma.done.wait (!%p1500_p1), %s1176_s10, 1024  }
 0x1db   : > { %1784 = vsyncadd (!%p1500_p1), %s1176_s10, 4294966272  ;;  %s1185_s30 = scalar_lea.sflag [#allocation8], %s1175_s8 }
 0x1dc   : > { %1786 = dma.done.wait (!%p1500_p1), %s1185_s30, 1024  }
 0x1dd   : > { %1788 = vsyncadd (!%p1500_p1), %s1185_s30, 4294966272  ;;  %p22_p11 = scmp.ge.s32.totalorder %s1871_s24, 4   ;;  %s2523_s18 = smov %s1795_s19 }
 0x1de   : > { %s2524_s19 = smov %s1799_s20  ;;  %s2525_s20 = smov %s1883_s27 }
 0x1df   : > { %s2526_s21 = smov %s1871_s24  ;;  %24 = sbr.rel (!%p22_p11) target bundleno = 7 (0x7), region = 129 }
 0x1e6   :  { %1190 = vsyncpa [#allocation3], 1 }
 0x1e7   :  { %1192 = vsyncpa [#allocation3 + $0x1], 1 }
 0x1e8   :  { %1193 = vsyncpa [#allocation4], 1 }
 0x1e9   :  { %1195 = vsyncpa [#allocation4 + $0x1], 1 }
 0x1ea   :  { %1196 = vsyncpa [#allocation8], 1 }
 0x1eb   :  { %1198 = vsyncpa [#allocation8 + $0x1], 1 }

</bundles_post_ra>
